<compile_context>
chip_gen: v7x
topology: tpu7x:2x2x1
jax: 0.10.0
libtpu: 0.0.40
codegen_flags: <defaults>
</compile_context>

<pallas_src>
import functools
import math

import jax
import jax.numpy as jnp
from jax import lax
from jax.experimental import pallas as pl
from jax.experimental.pallas import tpu as pltpu


def _pick_tile(dim, candidates):
    """Largest candidate tile that evenly divides `dim`, else the full dim."""
    for c in candidates:
        if dim % c == 0:
            return c
    return dim


# ------------------------------------------------------------------
# Tiled linear projection:  y = x @ w.T + b   (w kept in PyTorch (out, in) layout)
# ------------------------------------------------------------------
def _linear_kernel(x_ref, w_ref, b_ref, o_ref, acc_ref):
    k = pl.program_id(2)

    @pl.when(k == 0)
    def _():
        acc_ref[...] = jnp.zeros_like(acc_ref)

    # Contract last dims of x (tm, tk) and w (tn, tk): x @ w.T with no
    # transposed weight copy — the MXU consumes w directly.
    acc_ref[...] += lax.dot_general(
        x_ref[...], w_ref[...],
        dimension_numbers=(((1,), (1,)), ((), ())),
        preferred_element_type=jnp.float32)

    @pl.when(k == pl.num_programs(2) - 1)
    def _():
        o_ref[...] = (acc_ref[...] + b_ref[...]).astype(o_ref.dtype)


def linear(x, w, b):
    """x: (T, K), w: (Nout, K) (PyTorch layout), b: (Nout,) -> (T, Nout)."""
    T, K = x.shape
    Nout = w.shape[0]
    # Prefer 256-aligned output / 256-512 contraction tiles (v6e/v7x MXU);
    # fall back to the full dim for small shapes (block == full dim is legal).
    tm = _pick_tile(T, (256, 128, 8))
    tn = _pick_tile(Nout, (256, 128))
    tk = _pick_tile(K, (512, 256, 128))
    grid = (T // tm, Nout // tn, K // tk)
    return pl.pallas_call(
        _linear_kernel,
        out_shape=jax.ShapeDtypeStruct((T, Nout), x.dtype),
        grid=grid,
        in_specs=[
            pl.BlockSpec((tm, tk), lambda i, j, k: (i, k)),
            pl.BlockSpec((tn, tk), lambda i, j, k: (j, k)),
            pl.BlockSpec((1, tn), lambda i, j, k: (0, j)),
        ],
        out_specs=pl.BlockSpec((tm, tn), lambda i, j, k: (i, j)),
        scratch_shapes=[pltpu.VMEM((tm, tn), jnp.float32)],
        compiler_params=pltpu.CompilerParams(
            dimension_semantics=("parallel", "parallel", "arbitrary")),
    )(x, w, b.reshape(1, Nout))


# ------------------------------------------------------------------
# Flash-style attention kernel (online softmax over the S axis)
# ------------------------------------------------------------------
def _flash_mha_kernel(*refs, scale, has_mask):
    if has_mask:
        q_ref, k_ref, v_ref, mask_ref, o_ref, m_sc, l_sc, acc_sc = refs
    else:
        q_ref, k_ref, v_ref, o_ref, m_sc, l_sc, acc_sc = refs
        mask_ref = None

    s_idx = pl.program_id(2)

    @pl.when(s_idx == 0)
    def _():
        m_sc[...] = jnp.full_like(m_sc, -jnp.inf)
        l_sc[...] = jnp.zeros_like(l_sc)
        acc_sc[...] = jnp.zeros_like(acc_sc)

    # Pre-scale Q (tq*D multiplies instead of tq*ts on the score matrix).
    q = q_ref[...] * scale          # (1, tq, D)
    k = k_ref[...]                  # (1, ts, D)
    v = v_ref[...]                  # (1, ts, D)

    # Q K^T contracting the last dims — no transposed K copy.
    s = jnp.einsum("bqd,bkd->bqk", q, k,
                   preferred_element_type=jnp.float32)      # (1, tq, ts)
    if mask_ref is not None:
        s = s + mask_ref[...]                                # (1, 1, ts) additive

    m_prev = m_sc[...]
    m_new = jnp.maximum(m_prev, s.max(axis=-1, keepdims=True))
    alpha = jnp.exp(m_prev - m_new)
    p = jnp.exp(s - m_new)
    l_sc[...] = alpha * l_sc[...] + p.sum(axis=-1, keepdims=True)
    # PV in the input dtype: bf16 Q/K/V inputs -> bf16 MXU with f32 accumulate.
    acc_sc[...] = alpha * acc_sc[...] + jnp.einsum(
        "bqk,bkd->bqd", p.astype(v.dtype), v,
        preferred_element_type=jnp.float32)
    m_sc[...] = m_new

    @pl.when(s_idx == pl.num_programs(2) - 1)
    def _():
        # approx=True would use the (nearly free) EUP reciprocal; kept exact so
        # the f32 reference check at 1e-4 holds.
        inv = pl.reciprocal(l_sc[...], approx=False)
        o_ref[...] = (acc_sc[...] * inv).astype(o_ref.dtype)


def _flash_attention(q3, k3, v3, mask3, num_heads, scale):
    """q3: (BH, L, D), k3/v3: (BH, S, D), mask3: (N, 1, S) additive or None."""
    BH, L, D = q3.shape
    S = k3.shape[1]
    H = num_heads
    tq = _pick_tile(L, (256, 128))
    ts = _pick_tile(S, (512, 256, 128))
    grid = (BH, L // tq, S // ts)

    in_specs = [
        pl.BlockSpec((1, tq, D), lambda b, l, s: (b, l, 0)),
        pl.BlockSpec((1, ts, D), lambda b, l, s: (b, s, 0)),
        pl.BlockSpec((1, ts, D), lambda b, l, s: (b, s, 0)),
    ]
    args = [q3, k3, v3]
    if mask3 is not None:
        # Mask is per-batch (N, 1, S); heads share it via the index_map so the
        # H-fold broadcast never hits HBM.
        in_specs.append(pl.BlockSpec((1, 1, ts), lambda b, l, s: (b // H, 0, s)))
        args.append(mask3)

    kernel = functools.partial(_flash_mha_kernel, scale=scale,
                               has_mask=mask3 is not None)
    return pl.pallas_call(
        kernel,
        out_shape=jax.ShapeDtypeStruct((BH, L, D), q3.dtype),
        grid=grid,
        in_specs=in_specs,
        out_specs=pl.BlockSpec((1, tq, D), lambda b, l, s: (b, l, 0)),
        scratch_shapes=[
            pltpu.VMEM((1, tq, 1), jnp.float32),   # running max  m
            pltpu.VMEM((1, tq, 1), jnp.float32),   # running sum  l
            pltpu.VMEM((1, tq, D), jnp.float32),   # accumulator
        ],
        compiler_params=pltpu.CompilerParams(
            dimension_semantics=("parallel", "parallel", "arbitrary")),
    )(*args)


# ------------------------------------------------------------------
# Wrapper reproducing nn.MultiheadAttention forward
# ------------------------------------------------------------------
def multi_head_attention(query, key, value, params, num_heads,
                         key_padding_mask=None, need_weights=False):
    L, N, E = query.shape
    S = key.shape[0]
    H = num_heads
    D = E // H
    assert D * H == E, "embed_dim must be divisible by num_heads"

    in_w = params["in_proj_weight"]      # (3E, E)  PyTorch (out, in) layout
    in_b = params["in_proj_bias"]        # (3E,)
    out_w = params["out_proj_weight"]    # (E, E)
    out_b = params["out_proj_bias"]      # (E,)

    if query is key and key is value:
        # Self-attention: one fused QKV projection — reads the activations
        # once and gives the MXU a 3E-wide output dim.
        qkv = linear(query.reshape(L * N, E), in_w, in_b)     # (L*N, 3E)
        q2, k2, v2 = qkv[:, :E], qkv[:, E:2 * E], qkv[:, 2 * E:]
    else:
        q2 = linear(query.reshape(L * N, E), in_w[:E], in_b[:E])
        k2 = linear(key.reshape(S * N, E), in_w[E:2 * E], in_b[E:2 * E])
        v2 = linear(value.reshape(S * N, E), in_w[2 * E:], in_b[2 * E:])

    # Head reshuffle to (N*H, T, D), same as PyTorch.
    # TODO(synk): folding this relayout into the attention BlockSpecs would
    # need a size-1 second-to-last block dim over the (L, N, H, D) layout,
    # which violates the TPU (8,128)-divisible-or-full block rule, so the
    # reshuffle stays as an XLA op.
    q3 = q2.reshape(L, N * H, D).transpose(1, 0, 2)
    k3 = k2.reshape(S, N * H, D).transpose(1, 0, 2)
    v3 = v2.reshape(S, N * H, D).transpose(1, 0, 2)

    if key_padding_mask is None:
        mask3 = None    # no-mask kernel variant: no dummy mask DMA / add
    else:
        # key_padding_mask: (N, S) bool, True -> ignore that key position.
        # Large finite negative keeps fully-masked rows finite (PyTorch -> NaN).
        mask3 = jnp.where(key_padding_mask, -1e30, 0.0).astype(
            jnp.float32)[:, None, :]                          # (N, 1, S)

    attn = _flash_attention(q3, k3, v3, mask3, num_heads=H,
                            scale=1.0 / math.sqrt(D))

    # Back to (L, N, E) and apply the output projection.
    attn_flat = attn.transpose(1, 0, 2).reshape(L * N, E)
    out = linear(attn_flat, out_w, out_b).reshape(L, N, E)

    # TODO(synk): dropout, attn_mask and need_weights=True (averaged per-head
    # attention weights) are not implemented; the wrapper module calls with
    # need_weights=False so weights are None.
    return out, None


# ------------------------------------------------------------------
# Pure-JAX reference for correctness checking
# ------------------------------------------------------------------
def _ref_mha(query, key, value, params, num_heads, key_padding_mask=None):
    L, N, E = query.shape
    S = key.shape[0]
    H, D = num_heads, E // num_heads
    in_w, in_b = params["in_proj_weight"], params["in_proj_bias"]
    out_w, out_b = params["out_proj_weight"], params["out_proj_bias"]

    q = query.reshape(L * N, E) @ in_w[:E].T + in_b[:E]
    k = key.reshape(S * N, E) @ in_w[E:2 * E].T + in_b[E:2 * E]
    v = value.reshape(S * N, E) @ in_w[2 * E:].T + in_b[2 * E:]
    q = q.reshape(L, N * H, D).transpose(1, 0, 2)
    k = k.reshape(S, N * H, D).transpose(1, 0, 2)
    v = v.reshape(S, N * H, D).transpose(1, 0, 2)
    scores = jnp.einsum("bld,bsd->bls", q, k) / math.sqrt(D)
    if key_padding_mask is not None:
        m = jnp.where(key_padding_mask, -1e30, 0.0)        # (N, S)
        m = jnp.repeat(m, H, axis=0)[:, None, :]           # (N*H, 1, S)
        scores = scores + m
    attn = jax.nn.softmax(scores, axis=-1)
    o = jnp.einsum("bls,bsd->bld", attn, v)
    o = o.transpose(1, 0, 2).reshape(L * N, E)
    return (o @ out_w.T + out_b).reshape(L, N, E)


# ------------------------------------------------------------------
if __name__ == "__main__":
    L = S = 8      # sequence length
    N = 2          # batch
    E = 32         # embed_dim
    H = 4          # num_heads

    key0 = jax.random.PRNGKey(0)
    k1, k2, k3, k4, k5, k6, k7 = jax.random.split(key0, 7)

    # Deterministic parameter init (shapes match nn.MultiheadAttention).
    params = {
        "in_proj_weight": 0.1 * jax.random.normal(k1, (3 * E, E), jnp.float32),
        "in_proj_bias": 0.1 * jax.random.normal(k2, (3 * E,), jnp.float32),
        "out_proj_weight": 0.1 * jax.random.normal(k3, (E, E), jnp.float32),
        "out_proj_bias": 0.1 * jax.random.normal(k4, (E,), jnp.float32),
    }

    query = jax.random.normal(k5, (L, N, E), jnp.float32)
    key_in = jax.random.normal(k6, (S, N, E), jnp.float32)
    value = jax.random.normal(k7, (S, N, E), jnp.float32)

    # 1) Cross-attention, no key_padding_mask (no-mask kernel variant).
    out, weights = multi_head_attention(query, key_in, value, params, H,
                                        key_padding_mask=None,
                                        need_weights=False)
    out = jax.block_until_ready(out)
    ref = _ref_mha(query, key_in, value, params, H)
    assert out.shape == (L, N, E)
    assert weights is None
    assert jnp.allclose(out, ref, atol=1e-4, rtol=1e-4), "mismatch (no mask)"

    # 2) Self-attention (fused QKV projection path) with a key_padding_mask.
    kpm = jnp.zeros((N, S), dtype=bool).at[0, S - 2:].set(True)
    out2, _ = multi_head_attention(query, query, query, params, H,
                                   key_padding_mask=kpm, need_weights=False)
    out2 = jax.block_until_ready(out2)
    ref2 = _ref_mha(query, query, query, params, H, key_padding_mask=kpm)
    assert jnp.allclose(out2, ref2, atol=1e-4, rtol=1e-4), "mismatch (masked)"

    print("KERNEL_OK")
</pallas_src>

<mosaic_0001>
module attributes {stable_mosaic.version = 11 : i64} {
  func.func @_linear_kernel(%arg0: i32, %arg1: i32, %arg2: i32, %arg3: memref<8x32xf32, #tpu.memory_space<vmem>>, %arg4: memref<32x32xf32, #tpu.memory_space<vmem>>, %arg5: memref<1x32xf32, #tpu.memory_space<vmem>>, %arg6: memref<8x32xf32, #tpu.memory_space<vmem>>, %arg7: memref<8x32xf32, #tpu.memory_space<vmem>>) attributes {dimension_semantics = [#tpu.dimension_semantics<parallel>, #tpu.dimension_semantics<parallel>, #tpu.dimension_semantics<arbitrary>], iteration_bounds = array<i64: 2, 1, 1>, scalar_prefetch = 0 : i64, scratch_operands = 1 : i64, tpu.core_type = #tpu.core_type<tc>, window_params = [{transform_indices = @transform_0, window_bounds = array<i64: 8, 32>}, {transform_indices = @transform_1, window_bounds = array<i64: 32, 32>}, {transform_indices = @transform_2, window_bounds = array<i64: 1, 32>}, {transform_indices = @transform_3, window_bounds = array<i64: 8, 32>}]} {
    %c0_i32 = arith.constant 0 : i32
    %0 = arith.cmpi eq, %arg2, %c0_i32 : i32
    %1 = arith.extui %0 : i1 to i32
    %c0_i32_0 = arith.constant 0 : i32
    %2 = arith.cmpi ne, %1, %c0_i32_0 : i32
    scf.if %2 {
      %cst_10 = arith.constant 0.000000e+00 : f32
      %12 = vector.broadcast %cst_10 : f32 to vector<8x32xf32>
      %c0_11 = arith.constant 0 : index
      %c0_12 = arith.constant 0 : index
      %13 = vector.load %arg7[%c0_11, %c0_12] : memref<8x32xf32, #tpu.memory_space<vmem>>, vector<8x32xf32>
      tpu.vector_store %arg7[%c0_11, %c0_12], %12 {strides = array<i32>} : memref<8x32xf32, #tpu.memory_space<vmem>>, vector<8x32xf32>,
    } else {
    }
    %c0 = arith.constant 0 : index
    %c0_1 = arith.constant 0 : index
    %3 = vector.load %arg7[%c0, %c0_1] : memref<8x32xf32, #tpu.memory_space<vmem>>, vector<8x32xf32>
    %c0_2 = arith.constant 0 : index
    %c0_3 = arith.constant 0 : index
    %4 = vector.load %arg3[%c0_2, %c0_3] : memref<8x32xf32, #tpu.memory_space<vmem>>, vector<8x32xf32>
    %c0_4 = arith.constant 0 : index
    %c0_5 = arith.constant 0 : index
    %5 = vector.load %arg4[%c0_4, %c0_5] : memref<32x32xf32, #tpu.memory_space<vmem>>, vector<32x32xf32>
    %cst = arith.constant dense<0.000000e+00> : vector<8x32xf32>
    %6 = tpu.matmul %4, %5, %cst {dimension_numbers = #tpu.dot_dimension_numbers<[1], [1], [0], [0], [0, 0, 1, 0], [], []>} : vector<8x32xf32>, vector<32x32xf32>, vector<8x32xf32> -> vector<8x32xf32>
    %7 = arith.addf %3, %6 : vector<8x32xf32>
    %c0_6 = arith.constant 0 : index
    %c0_7 = arith.constant 0 : index
    %8 = vector.load %arg7[%c0_6, %c0_7] : memref<8x32xf32, #tpu.memory_space<vmem>>, vector<8x32xf32>
    tpu.vector_store %arg7[%c0_6, %c0_7], %7 {strides = array<i32>} : memref<8x32xf32, #tpu.memory_space<vmem>>, vector<8x32xf32>,
    %c0_i32_8 = arith.constant 0 : i32
    %9 = arith.cmpi eq, %arg2, %c0_i32_8 : i32
    %10 = arith.extui %9 : i1 to i32
    %c0_i32_9 = arith.constant 0 : i32
    %11 = arith.cmpi ne, %10, %c0_i32_9 : i32
    scf.if %11 {
      %c0_10 = arith.constant 0 : index
      %c0_11 = arith.constant 0 : index
      %12 = vector.load %arg7[%c0_10, %c0_11] : memref<8x32xf32, #tpu.memory_space<vmem>>, vector<8x32xf32>
      %c0_12 = arith.constant 0 : index
      %c0_13 = arith.constant 0 : index
      %13 = vector.load %arg5[%c0_12, %c0_13] : memref<1x32xf32, #tpu.memory_space<vmem>>, vector<1x32xf32>
      %14 = vector.broadcast %13 : vector<1x32xf32> to vector<8x32xf32>
      %15 = arith.addf %12, %14 : vector<8x32xf32>
      %c0_14 = arith.constant 0 : index
      %c0_15 = arith.constant 0 : index
      %16 = vector.load %arg6[%c0_14, %c0_15] : memref<8x32xf32, #tpu.memory_space<vmem>>, vector<8x32xf32>
      tpu.vector_store %arg6[%c0_14, %c0_15], %15 {strides = array<i32>} : memref<8x32xf32, #tpu.memory_space<vmem>>, vector<8x32xf32>,
    } else {
    }
    return
  }
  func.func @transform_0(%arg0: i32, %arg1: i32, %arg2: i32) -> (i32, i32) {
    %c0_i32 = arith.constant 0 : i32
    return %arg0, %arg2 : i32, i32
  }
  func.func @transform_1(%arg0: i32, %arg1: i32, %arg2: i32) -> (i32, i32) {
    %c0_i32 = arith.constant 0 : i32
    return %arg1, %arg2 : i32, i32
  }
  func.func @transform_2(%arg0: i32, %arg1: i32, %arg2: i32) -> (i32, i32) {
    %c0_i32 = arith.constant 0 : i32
    %c0_i32_0 = arith.constant 0 : i32
    return %c0_i32, %arg1 : i32, i32
  }
  func.func @transform_3(%arg0: i32, %arg1: i32, %arg2: i32) -> (i32, i32) {
    %c0_i32 = arith.constant 0 : i32
    return %arg0, %arg1 : i32, i32
  }
}

</mosaic_0001>

<bundles_post_ra>
// kernel: tpu_custom_call.1
= control target key start
LH: loop header
LB: loop body
LE: loop exit
PB: predicated region body
PF: predicated region fallthrough
CT: control target
= control target key end

     0   :  { %8 = vsyncpa [#allocation4], 0  ;;  %s1013_s0 = inlined_call_operand.hbm [shape: f32[16,32], index: 0, kind: input, shape index: {}]   ;;  %s1014_s1 = inlined_call_operand.hbm [shape: f32[32,32], index: 1, kind: input, shape index: {}]   ;;  %s1015_s2 = inlined_call_operand.vmem [shape: f32[1,32], index: 2, kind: input, shape index: {}]   ;;  %s1016_s3 = inlined_call_operand.hbm [shape: f32[16,32], index: 3, kind: output, shape index: {}]  }
   0x1   :  { %10 = vsyncpa [#allocation4 + $0x1], 0 }
   0x2   :  { %11 = vsyncpa [#allocation7], 0 }
   0x3   :  { %12 = vsyncpa [#allocation5], 0 }
   0x4   :  { %14 = vsyncpa [#allocation5 + $0x1], 0  ;;  %s786_s12 = smov 0   ;;  %s788_s13 = smov 0  }
   0x5   :  { %s790_s14 = smov 0   ;;  %s792_s15 = smov 0  }
   0x6   :  { %s794_s16 = smov 0   ;;  %s796_s17 = smov 0  }
   0x7 LB: > { %s488_s18 = sadd.s32 4294967295, %s756_s17   ;;  %s489_s19 = sadd.s32 4294967294, %s756_s17   ;;  %s756_s17 = sphi %s796_s17, %s20_s17   ;;  %s752_s16 = sphi %s794_s16, %s1040_s16   ;;  %s748_s15 = sphi %s792_s15, %s1039_s15   ;;  %s744_s14 = sphi %s790_s14, %s1038_s14   ;;  %s740_s13 = sphi %s788_s13, %s1037_s13   ;;  %s736_s12 = sphi %s786_s12, %s1036_s12  }
   0x8   : > { %p61_p0 = scmp.ne.s32.totalorder %s740_s13, %s736_s12  ;;  %p820_p1 = scmp.eq.s32.totalorder %s488_s18, 0 }
   0x9   : > { %p824_p2 = scmp.eq.s32.totalorder %s488_s18, 1  ;;  %p147_p3 = scmp.eq.s32.totalorder %s489_s19, 1 }
   0xa   : > { %s1021_s20 = scalar_select %p820_p1, 1, 0 }
   0xb   : > { %s1022_s21 = scalar_select %p824_p2, 1, 0 }
   0xc   : > { %p830_p4 = por %p820_p1, %p61_p0  ;;  %p490_p5 = scmp.ge.s32.totalorder %s756_s17, 1 }
   0xd   : > { %p835_p6 = por %p147_p3, %p61_p0  ;;  %p154_p7 = scmp.lt.s32.totalorder %s756_s17, 3 }
   0xe   : > { %s1023_s22 = scalar_select %p830_p4, 1, 0 }
   0xf   : > { %s1024_s23 = scalar_select %p835_p6, 1, 0 }
  0x10   : > { %p840_p8 = pnand %p490_p5, %p154_p7  ;;  %s758_s25 = smov [#allocation6]  }
  0x11   : > { %s170_s26 = sshll.u32 %s758_s25, 4  ;;  %s39_s28 = sadd.s32 1, %s752_s16  ;;  %s171_s26 = int_to_ptr.vmem [resolvable:$true] %s170_s26 }
  0x12   : > { %s1025_s24 = scalar_select %p840_p8, 1, 0 }
  0x13   : > { %p542_p9 = pneg %p840_p8  ;;  %s612_s4 = scalar_lea.hbm %s1014_s1, 512 }
  0x14   : > { %p613_p12 = scmp.ne.s32.totalorder %s1014_s1, %s612_s4  ;;  %p619_p5 = scmp.lt.u32.totalorder %s612_s4, %s1014_s1 }
  0x15   : > { %p849_p11 = pnand %p542_p9, %p820_p1 }
  0x17   : > { %p614_p13 = pneg %p849_p11 }
  0x19   : > { %p615_p0 = pnand %p614_p13, %p613_p12 }
  0x1b   : > { %p616_p3 = pneg %p615_p0 }
  0x1d   : > { %p621_p7 = pnand %p619_p5, %p616_p3 }
  0x1f   : > { %624 = shalt.err (!%p621_p7)
}
  0x20   : > { %s625_s9 = scalar_lea.vmem %s171_s26, 512  ;;  %p633_p1 = scmp.lt.s32.totalorder %s171_s26, %s171_s26 }
  0x21   : > { %p626_p9 = scmp.ne.s32.totalorder %s171_s26, %s625_s9  ;;  %p634_p4 = scmp.lt.s32.totalorder %s625_s9, %s625_s9 }
  0x23   : > { %p628_p10 = pnand %p626_p9, %p614_p13  ;;  %p635_p8 = por %p634_p4, %p633_p1 }
  0x25   : > { %p629_p6 = pneg %p628_p10 }
  0x27   : > { %p636_p2 = pnand %p635_p8, %p629_p6 }
  0x29   : > { %639 = shalt.err (!%p636_p2)
}
  0x2a   : > { %s759_s10 = smov 128   ;;  %s760_s11 = smov 8  }
  0x2b   : > { %545 = dma.hbm_to_vmem [thread:$0]  (!%p849_p11), %s1014_s1, 512, %s171_s26, [#allocation7], %s759_s10, %s759_s10, %s760_s11  }
  0x2c   : > { %p41_p1 = scmp.ge.s32.totalorder %s39_s28, 2  ;;  %s48_s25 = sadd.s32 1, %s744_s14 }
  0x2d   : > { %p55_p2 = scmp.ne.s32.totalorder %s744_s14, %s740_s13  ;;  %p56_p4 = scmp.eq.s32.totalorder %s756_s17, 0 }
  0x2e   : > { %s1042_s28 = smov (%p41_p1, %s39_s28), 0  ;;  %p1028_p8 = scmp.ne.s32.totalorder %s1022_s21, 0 }
  0x2f   : > { %p876_p6 = por %p56_p4, %p55_p2  ;;  %s43_s27 = ssub.s32 %s752_s16, %s1042_s28 }
  0x30   : > { %p882_p10 = por %p1028_p8, %p55_p2  ;;  %p555_p12 = scmp.lt.s32.totalorder %s756_s17, 2 }
  0x31   : > { %p46_p11 = scmp.eq.s32.totalorder %s43_s27, 0  ;;  %s190_s26 = sand.u32 1, %s744_s14  }
  0x32   : > { %s494_s4 = sshll.u32 %s190_s26, 3  ;;  %s495_s6 = sshll.u32 %s752_s16, 7 }
  0x33   : > { %s891_s5 = scalar_select %p46_p11, %s744_s14, %s48_s25  }
  0x34   : > { %s897_s9 = scalar_lea.hbm %s1013_s0, %s495_s6  ;;  %s194_s21 = scalar_lea.vmem [#allocation3], %s494_s4 }
  0x35   : > { %s202_s10 = sshll.u32 %s194_s21, 4  ;;  %p903_p13 = pnand %p555_p12, %p876_p6  ;;  %s899_s10 = int_to_ptr.vmem [resolvable:$true] %s202_s10 }
  0x36   : > { %s191_s18 = scalar_lea.sflag [#allocation4], %s190_s26  ;;  %s640_s19 = scalar_lea.hbm %s897_s9, 128 }
  0x37   : > { %p641_p0 = scmp.ne.s32.totalorder %s897_s9, %s640_s19  ;;  %p642_p3 = pneg %p903_p13 }
  0x38   : > { %s645_s4 = scalar_lea.hbm %s1013_s0, 256  ;;  %p646_p9 = scmp.lt.u32.totalorder %s897_s9, %s1013_s0 }
  0x39   : > { %p643_p5 = pnand %p642_p3, %p641_p0  ;;  %p647_p1 = scmp.lt.u32.totalorder %s645_s4, %s640_s19 }
  0x3a   : > { %p649_p4 = scmp.lt.u32.totalorder %s640_s19, %s897_s9 }
  0x3b   : > { %p644_p7 = pneg %p643_p5  ;;  %p648_p2 = por %p647_p1, %p646_p9 }
  0x3d   : > { %p650_p6 = por %p649_p4, %p648_p2 }
  0x3f   : > { %p651_p8 = pnand %p650_p6, %p644_p7 }
  0x41   : > { %654 = shalt.err (!%p651_p8)
}
  0x42   : > { %s655_s26 = scalar_lea.vmem %s899_s10, 128  ;;  %s761_s7 = smov [#allocation3]  }
  0x43   : > { %p656_p12 = scmp.ne.s32.totalorder %s899_s10, %s655_s26  ;;  %s660_s8 = sshll.u32 %s761_s7, 4  ;;  %s661_s8 = int_to_ptr.vmem [resolvable:$false] %s660_s8 }
  0x44   : > { %s662_s21 = scalar_lea.vmem %s661_s8, 256  ;;  %p663_p5 = scmp.lt.s32.totalorder %s899_s10, %s661_s8 }
  0x45   : > { %p658_p11 = pnand %p656_p12, %p642_p3  ;;  %p664_p9 = scmp.lt.s32.totalorder %s662_s21, %s655_s26 }
  0x47   : > { %p659_p0 = pneg %p658_p11  ;;  %p665_p1 = por %p664_p9, %p663_p5 }
  0x49   : > { %p666_p2 = pnand %p665_p1, %p659_p0 }
  0x4b   : > { %669 = shalt.err (!%p666_p2)
}
  0x4c   : > { %549 = dma.hbm_to_vmem [thread:$0]  (!%p903_p13), %s897_s9, 128, %s899_s10, %s191_s18  }
  0x4d   : > { %p1031_p7 = scmp.ne.s32.totalorder %s1025_s24, 0 }
  0x4e   : > { %s935_s19 = sand.u32 (!%p1031_p7), 1, %s740_s13   ;;  %p1032_p3 = scmp.ne.s32.totalorder (!%p1031_p7), %s1023_s22, 0 }
  0x4f   : > { %211 = sbr.rel (%p1031_p7) target bundleno = 347 (0x15b), region = 32  ;;  %s497_s25 = sshll.u32 (!%p1031_p7), %s935_s19, 3 }
  0x50   : > { %s214_s27 = scalar_lea.sflag (!%p1031_p7), [#allocation4], %s935_s19  ;;  %s217_s4 = scalar_lea.vmem (!%p1031_p7), [#allocation3], %s497_s25 }
  0x56   : > { %723 = dma.done.wait (%p1032_p3), %s214_s27, 128  }
  0x57   : > { %725 = vsyncadd (%p1032_p3), %s214_s27, 4294967168  ;;  %p1033_p13 = scmp.ne.s32.totalorder %s1021_s20, 0 }
  0x59   : > { %727 = dma.done.wait (%p1033_p13), [#allocation7], 512  }
  0x5a   : > { %729 = vsyncadd (%p1033_p13), [#allocation7], 4294966784  ;;  %vm255_vm0 = vcmask 261120   ;;  %v762_v0 = vmov 0.0|0.0   ;;  %v763_v1 = vmov 0.0   ;;  %vm764_vm1 = vmmov 0  }
  0x5b   : > { %526 = vmatprep.subr.bf16.mxu0 %v762_v0  ;;  %256 = vst.msk [vmem:[#allocation2] sm:$0xff] %vm255_vm0, %v763_v1  ;;  %523 = vmatprep.mubr.msk.f32.mxu0 %vm764_vm1, %v763_v1  ;;  %v259_v2 = vld [vmem:[#allocation6] sm:$0xff]  ;;  %v260_v3 = vld [vmem:[#allocation6 + $0x8] sm:$0xff]  ;;  %vm528_vm2 = vmpackc.low %vm255_vm0, %vm255_vm0  ;;  %s507_s24 = sshll.u32 %s748_s15, 7  ;;  %s246_s9 = scalar_lea.vmem [#allocation8], %s497_s25 }
  0x5c   : > { %v527_v4 = vpack.c.bf16 %v260_v3, %v259_v2  ;;  %v261_v5 = vld [vmem:[#allocation6 + $0x10] sm:$0xff]  ;;  %v262_v6 = vld [vmem:[#allocation6 + $0x18] sm:$0xff]  ;;  %v505_v13 = vld [vmem:[%s1015_s2] ss:$0 sm:$0xff]  ;;  %s379_s10 = sshll.u32 %s246_s9, 4  ;;  %s963_s29 = scalar_lea.hbm %s1016_s3, %s507_s24  ;;  %s965_s10 = int_to_ptr.vmem [resolvable:$true] %s379_s10 }
  0x5d   : > { %v531_v7 = vpack.c.bf16 %v262_v6, %v261_v5  ;;  %v258_v8 = vld [vmem:[%s217_s4] sm:$0xff]  ;;  %s365_s6 = scalar_lea.sflag [#allocation5], %s935_s19  ;;  %s670_s26 = scalar_lea.vmem %s965_s10, 128 }
  0x5e   : > { %529 = vmatpush3.bf16.xpose.msk.msra.mxu0 %vm528_vm2, %v527_v4  ;;  %p671_p4 = scmp.ne.s32.totalorder %s965_s10, %s670_s26  ;;  %s765_s15 = smov [#allocation8]  }
  0x5f   : > { %530 = vmatprep.subr.bf16.mxu0 %v762_v0  ;;  %s674_s7 = sshll.u32 %s765_s15, 4  ;;  %s675_s7 = int_to_ptr.vmem [resolvable:$false] %s674_s7 }
  0x60   : > { %p672_p6 = pnand %p671_p4, %p882_p10  ;;  %s676_s8 = scalar_lea.vmem %s675_s7, 256 }
  0x61   : > { %p677_p12 = scmp.lt.s32.totalorder %s965_s10, %s675_s7  ;;  %p678_p11 = scmp.lt.s32.totalorder %s676_s8, %s670_s26 }
  0x62   : > { %v257_v9 = vld [vmem:[#allocation2] sm:$0xff]  ;;  %p673_p8 = pneg %p672_p6 }
  0x63   : > { %p679_p0 = por %p678_p11, %p677_p12 }
  0x65   : > { %p680_p5 = pnand %p679_p0, %p673_p8 }
  0x66   : > { %533 = vmatpush3.bf16.xpose.msk.msra.mxu0 %vm528_vm2, %v531_v7 }
  0x6d   : > { %524 = vmatmul.mubr.msk.f32.vlgmr.msra.gmra.mrb[0].mxu0 %vm255_vm0, %v258_v8 }
 0x140   : > { %v345_v10 = vpop.f32.mrb[0].mxu0 }
 0x141   : > { %v349_v11 = vadd.f32 %v345_v10, %v257_v9  ;;  %v525_v12 = vpop.f32.mrb[1].mxu0 }
 0x143   : > { %350 = vst.msk [vmem:[#allocation2] sm:$0xff] %vm255_vm0, %v349_v11 }
 0x14a   : > { %v354_v14 = vld [vmem:[#allocation2] sm:$0xff] }
 0x14b   : > { %v362_v15 = vadd.f32 %v505_v13, %v354_v14 }
 0x14d   : > { %363 = vst.msk [vmem:[%s246_s9] sm:$0xff] %vm255_vm0, %v362_v15 }
 0x14e   : > { %683 = shalt.err (!%p680_p5)
}
 0x14f   : > { %s684_s21 = scalar_lea.hbm %s963_s29, 128  ;;  %s688_s27 = scalar_lea.hbm %s1016_s3, 256 }
 0x150   : > { %p685_p9 = scmp.ne.s32.totalorder %s963_s29, %s684_s21  ;;  %p689_p7 = scmp.lt.u32.totalorder %s963_s29, %s1016_s3 }
 0x151   : > { %p690_p3 = scmp.lt.u32.totalorder %s688_s27, %s684_s21  ;;  %p692_p4 = scmp.lt.u32.totalorder %s684_s21, %s963_s29 }
 0x152   : > { %p686_p1 = pnand %p685_p9, %p882_p10 }
 0x153   : > { %p691_p13 = por %p690_p3, %p689_p7 }
 0x154   : > { %p687_p2 = pneg %p686_p1 }
 0x155   : > { %p693_p6 = por %p692_p4, %p691_p13 }
 0x157   : > { %p694_p8 = pnand %p693_p6, %p687_p2 }
 0x159   : > { %697 = shalt.err (!%p694_p8)
}
 0x15a   : > { %540 = dma.vmem_to_hbm [thread:$0]  (%p882_p10), %s965_s10, 128, %s963_s29, %s365_s6  }
 0x15b PF: > { %s391_s22 = sand.u32 1, %s736_s12   ;;  %p1034_p12 = scmp.ne.s32.totalorder %s1024_s23, 0 }
 0x15c   : > { %p1035_p11 = scmp.ge.s32.totalorder %s756_s17, 2  ;;  %s392_s24 = scalar_lea.sflag [#allocation5], %s391_s22 }
 0x15e   : > { %p551_p0 = pnand %p1035_p11, %p1034_p12 }
 0x160   : > { %731 = dma.done.wait (!%p551_p0), %s392_s24, 128  }
 0x161   : > { %733 = vsyncadd (!%p551_p0), %s392_s24, 4294967168  ;;  %s20_s17 = sadd.s32 1, %s756_s17   ;;  %s1036_s12 = smov %s740_s13 }
 0x162   : > { %p17_p5 = scmp.ge.s32.totalorder %s20_s17, 4   ;;  %s1037_s13 = smov %s744_s14 }
 0x163   : > { %s1038_s14 = smov %s891_s5  ;;  %s1039_s15 = smov %s752_s16 }
 0x164   : > { %s1040_s16 = smov %s1042_s28  ;;  %19 = sbr.rel (!%p17_p5) target bundleno = 7 (0x7), region = 93 }
 0x16b   :  { %397 = vsyncpa [#allocation4], 1 }
 0x16c   :  { %399 = vsyncpa [#allocation4 + $0x1], 1 }
 0x16d   :  { %400 = vsyncpa [#allocation7], 1 }
 0x16e   :  { %401 = vsyncpa [#allocation5], 1 }
 0x16f   :  { %403 = vsyncpa [#allocation5 + $0x1], 1 }

</bundles_post_ra>
